<compile_context>
chip_gen: v7x
topology: tpu7x:2x2x1
jax: 0.10.0
libtpu: 0.0.40
codegen_flags: <defaults>
</compile_context>

<pallas_src>
import functools

import jax
import jax.numpy as jnp
from jax import lax
from jax.experimental import pallas as pl
from jax.experimental.pallas import tpu as pltpu


def _tv_kernel(mask_ref, x_ref, out_v_ref, out_h_ref, acc_v_ref, acc_h_ref, *,
               h: int, w: int, block_rows: int, num_blocks: int,
               last_rows: int, compute_dtype):
    """Process one (block_rows, H*W) block; write (8, 1) partial sums."""
    l = h * w
    mask_h = mask_ref[...]                         # (1, L-1) f32, loaded once

    acc_v_ref[...] = jnp.zeros_like(acc_v_ref)     # (8, 1) f32
    acc_h_ref[...] = jnp.zeros_like(acc_h_ref)     # (8, 1) f32

    def add_group(xg):
        # xg: (8, L) in compute_dtype.
        # Vertical neighbours: flat offset +W; every j < L-W is a valid pair.
        dv = jnp.abs(xg[:, : l - w] - xg[:, w:]).astype(jnp.float32)
        # Horizontal neighbours: flat offset +1, zeroed at row wrap via mask.
        dh = jnp.abs(xg[:, : l - 1] - xg[:, 1:]).astype(jnp.float32) * mask_h
        # Cross-lane reduce (XLU, otherwise idle) into tiny f32 accumulators.
        acc_v_ref[...] += jnp.sum(dv, axis=-1, keepdims=True)
        acc_h_ref[...] += jnp.sum(dh, axis=-1, keepdims=True)

    def run_groups(full_groups: int, tail_rows: int):
        if full_groups > 0:
            def body(gi, carry):
                start = pl.multiple_of(gi * 8, 8)
                add_group(x_ref[pl.ds(start, 8), :].astype(compute_dtype))
                return carry
            lax.fori_loop(0, full_groups, body, 0,
                          unroll=True if full_groups <= 8 else 8)
        if tail_rows > 0:
            # Ragged tail: rows past the valid range hold garbage -> select 0.
            xg = x_ref[pl.ds(full_groups * 8, 8), :].astype(compute_dtype)
            row = lax.broadcasted_iota(jnp.int32, (8, 1), 0)
            add_group(jnp.where(row < tail_rows, xg, jnp.zeros_like(xg)))

    if last_rows == block_rows:
        # All blocks are full.
        run_groups(block_rows // 8, 0)
    elif num_blocks == 1:
        # Single (partial) block.
        run_groups(last_rows // 8, last_rows % 8)
    else:
        is_last = pl.program_id(0) == num_blocks - 1

        @pl.when(jnp.logical_not(is_last))
        def _():
            run_groups(block_rows // 8, 0)

        @pl.when(is_last)
        def _():
            run_groups(last_rows // 8, last_rows % 8)

    out_v_ref[0] = acc_v_ref[...]
    out_h_ref[0] = acc_h_ref[...]


def _block_rows(m: int, l: int, itemsize: int,
                target_bytes: int = 4 << 20) -> int:
    """Rows per block: multiple of 8, ~target_bytes of input, <= padded rows."""
    m_pad8 = -(-m // 8) * 8
    b = max(8, (target_bytes // (l * itemsize)) // 8 * 8)
    b = min(b, m_pad8)
    # Keep >= ~8 grid steps (v7x dual-TC / megacore sharding) when the problem
    # is big enough that each block still stays >= ~1 MiB.
    if m_pad8 * l * itemsize >= 8 * (1 << 20):
        b = min(b, max(8, (m_pad8 // 8) // 8 * 8))
    return b


def tv_loss(img: jax.Array) -> jax.Array:
    """Equivalent of TVLoss.forward for NCHW input (any float dtype)."""
    n, c, h, w = img.shape
    m = n * c
    l = h * w

    # Pure metadata reshape: each row is one flattened (H, W) slice.
    x = img.reshape(m, l)
    itemsize = jnp.dtype(img.dtype).itemsize
    compute_dtype = jnp.bfloat16 if img.dtype == jnp.bfloat16 else jnp.float32

    b = _block_rows(m, l, itemsize)
    g = -(-m // b)                       # number of blocks (ceil)
    last_rows = m - (g - 1) * b          # valid rows in the last block (static)

    # Precomputed horizontal wrap mask: zero where j % W == W-1 (pair would
    # cross an image-row boundary).  Tiny, loaded once into VMEM.
    col = jnp.arange(l - 1, dtype=jnp.int32)
    mask = (col % w != w - 1).astype(jnp.float32).reshape(1, l - 1)

    kernel = functools.partial(
        _tv_kernel, h=h, w=w, block_rows=b, num_blocks=g,
        last_rows=last_rows, compute_dtype=compute_dtype)

    part_v, part_h = pl.pallas_call(
        kernel,
        out_shape=(
            jax.ShapeDtypeStruct((g, 8, 1), jnp.float32),
            jax.ShapeDtypeStruct((g, 8, 1), jnp.float32),
        ),
        grid_spec=pltpu.PrefetchScalarGridSpec(
            num_scalar_prefetch=0,
            grid=(g,),
            in_specs=[
                pl.BlockSpec((1, l - 1), lambda i: (0, 0)),   # wrap mask
                pl.BlockSpec((b, l), lambda i: (i, 0)),       # image rows
            ],
            out_specs=(
                pl.BlockSpec((1, 8, 1), lambda i: (i, 0, 0)),
                pl.BlockSpec((1, 8, 1), lambda i: (i, 0, 0)),
            ),
            scratch_shapes=[
                pltpu.VMEM((8, 1), jnp.float32),
                pltpu.VMEM((8, 1), jnp.float32),
            ],
        ),
        compiler_params=pltpu.CompilerParams(
            dimension_semantics=("parallel",),
            vmem_limit_bytes=48 * 1024 * 1024,
        ),
    )(mask, x)

    # Tiny final reduction (2 * G * 8 floats); divisors match torch.mean over
    # the sliced tensors.
    sum_v = jnp.sum(part_v)
    sum_h = jnp.sum(part_h)
    mean_v = sum_v / jnp.float32(m * (h - 1) * w)
    mean_h = sum_h / jnp.float32(m * h * (w - 1))
    return mean_v + mean_h


def tv_loss_ref(img: jax.Array) -> jax.Array:
    """Pure-JAX reference matching the PyTorch module."""
    dv = jnp.abs(img[:, :, :-1, :] - img[:, :, 1:, :])
    dh = jnp.abs(img[:, :, :, :-1] - img[:, :, :, 1:])
    return jnp.mean(dv) + jnp.mean(dh)


if __name__ == "__main__":
    key = jax.random.PRNGKey(0)
    img = jax.random.normal(key, (2, 4, 16, 16), dtype=jnp.float32)

    out = jax.block_until_ready(tv_loss(img))
    ref = jax.block_until_ready(tv_loss_ref(img))

    assert jnp.allclose(out, ref, rtol=1e-5, atol=1e-5), (out, ref)
    print("KERNEL_OK")
</pallas_src>

<mosaic_0001>
module attributes {stable_mosaic.version = 11 : i64} {
  func.func @_tv_kernel(%arg0: i32, %arg1: memref<1x255xf32, #tpu.memory_space<vmem>>, %arg2: memref<8x256xf32, #tpu.memory_space<vmem>>, %arg3: memref<1x8x1xf32, #tpu.memory_space<vmem>>, %arg4: memref<1x8x1xf32, #tpu.memory_space<vmem>>, %arg5: memref<8x1xf32, #tpu.memory_space<vmem>>, %arg6: memref<8x1xf32, #tpu.memory_space<vmem>>) attributes {dimension_semantics = [#tpu.dimension_semantics<parallel>], iteration_bounds = array<i64: 1>, scalar_prefetch = 0 : i64, scratch_operands = 2 : i64, tpu.core_type = #tpu.core_type<tc>, window_params = [{pipeline_mode = #tpu.pipeline_mode<synchronous>, transform_indices = @transform_0, window_bounds = array<i64: 1, 255>}, {transform_indices = @transform_1, window_bounds = array<i64: 8, 256>}, {transform_indices = @transform_2, window_bounds = array<i64: 1, 8, 1>}, {transform_indices = @transform_3, window_bounds = array<i64: 1, 8, 1>}]} {
    %c0 = arith.constant 0 : index
    %c0_0 = arith.constant 0 : index
    %0 = vector.load %arg1[%c0, %c0_0] : memref<1x255xf32, #tpu.memory_space<vmem>>, vector<1x255xf32>
    %cst = arith.constant 0.000000e+00 : f32
    %1 = vector.broadcast %cst : f32 to vector<8x1xf32>
    %c0_1 = arith.constant 0 : index
    %c0_2 = arith.constant 0 : index
    %2 = vector.load %arg5[%c0_1, %c0_2] : memref<8x1xf32, #tpu.memory_space<vmem>>, vector<8x1xf32>
    tpu.vector_store %arg5[%c0_1, %c0_2], %1 {strides = array<i32>} : memref<8x1xf32, #tpu.memory_space<vmem>>, vector<8x1xf32>,
    %cst_3 = arith.constant 0.000000e+00 : f32
    %3 = vector.broadcast %cst_3 : f32 to vector<8x1xf32>
    %c0_4 = arith.constant 0 : index
    %c0_5 = arith.constant 0 : index
    %4 = vector.load %arg6[%c0_4, %c0_5] : memref<8x1xf32, #tpu.memory_space<vmem>>, vector<8x1xf32>
    tpu.vector_store %arg6[%c0_4, %c0_5], %3 {strides = array<i32>} : memref<8x1xf32, #tpu.memory_space<vmem>>, vector<8x1xf32>,
    %c0_i32 = arith.constant 0 : i32
    %c8_i32 = arith.constant 8 : i32
    %5 = arith.muli %c0_i32, %c8_i32 : i32
    %6 = tpu.assume_multiple %5, 8 : i32
    %7 = arith.index_cast %6 : i32 to index
    %c0_6 = arith.constant 0 : index
    %8 = vector.load %arg2[%7, %c0_6] : memref<8x256xf32, #tpu.memory_space<vmem>>, vector<8x256xf32>
    %9 = vector.extract_strided_slice %8 {offsets = [0, 0], sizes = [8, 240], strides = [1, 1]} : vector<8x256xf32> to vector<8x240xf32>
    %10 = vector.extract_strided_slice %8 {offsets = [0, 16], sizes = [8, 240], strides = [1, 1]} : vector<8x256xf32> to vector<8x240xf32>
    %11 = arith.subf %9, %10 : vector<8x240xf32>
    %12 = math.absf %11 : vector<8x240xf32>
    %13 = vector.extract_strided_slice %8 {offsets = [0, 0], sizes = [8, 255], strides = [1, 1]} : vector<8x256xf32> to vector<8x255xf32>
    %14 = vector.extract_strided_slice %8 {offsets = [0, 1], sizes = [8, 255], strides = [1, 1]} : vector<8x256xf32> to vector<8x255xf32>
    %15 = arith.subf %13, %14 : vector<8x255xf32>
    %16 = math.absf %15 : vector<8x255xf32>
    %17 = vector.broadcast %0 : vector<1x255xf32> to vector<8x255xf32>
    %18 = arith.mulf %16, %17 : vector<8x255xf32>
    %c0_7 = arith.constant 0 : index
    %c0_8 = arith.constant 0 : index
    %19 = vector.load %arg5[%c0_7, %c0_8] : memref<8x1xf32, #tpu.memory_space<vmem>>, vector<8x1xf32>
    %cst_9 = arith.constant dense<0.000000e+00> : vector<8xf32>
    %20 = vector.multi_reduction <add>, %12, %cst_9 [1] : vector<8x240xf32> to vector<8xf32>
    %21 = vector.shape_cast %20 : vector<8xf32> to vector<8x1xf32>
    %22 = arith.addf %19, %21 : vector<8x1xf32>
    %c0_10 = arith.constant 0 : index
    %c0_11 = arith.constant 0 : index
    %23 = vector.load %arg5[%c0_10, %c0_11] : memref<8x1xf32, #tpu.memory_space<vmem>>, vector<8x1xf32>
    tpu.vector_store %arg5[%c0_10, %c0_11], %22 {strides = array<i32>} : memref<8x1xf32, #tpu.memory_space<vmem>>, vector<8x1xf32>,
    %c0_12 = arith.constant 0 : index
    %c0_13 = arith.constant 0 : index
    %24 = vector.load %arg6[%c0_12, %c0_13] : memref<8x1xf32, #tpu.memory_space<vmem>>, vector<8x1xf32>
    %cst_14 = arith.constant dense<0.000000e+00> : vector<8xf32>
    %25 = vector.multi_reduction <add>, %18, %cst_14 [1] : vector<8x255xf32> to vector<8xf32>
    %26 = vector.shape_cast %25 : vector<8xf32> to vector<8x1xf32>
    %27 = arith.addf %24, %26 : vector<8x1xf32>
    %c0_15 = arith.constant 0 : index
    %c0_16 = arith.constant 0 : index
    %28 = vector.load %arg6[%c0_15, %c0_16] : memref<8x1xf32, #tpu.memory_space<vmem>>, vector<8x1xf32>
    tpu.vector_store %arg6[%c0_15, %c0_16], %27 {strides = array<i32>} : memref<8x1xf32, #tpu.memory_space<vmem>>, vector<8x1xf32>,
    %c1_i32 = arith.constant 1 : i32
    %c0_17 = arith.constant 0 : index
    %c0_18 = arith.constant 0 : index
    %29 = vector.load %arg5[%c0_17, %c0_18] : memref<8x1xf32, #tpu.memory_space<vmem>>, vector<8x1xf32>
    %c0_19 = arith.constant 0 : index
    %c0_20 = arith.constant 0 : index
    %c0_21 = arith.constant 0 : index
    %30 = vector.load %arg3[%c0_19, %c0_20, %c0_21] : memref<1x8x1xf32, #tpu.memory_space<vmem>>, vector<1x8x1xf32>
    %31 = vector.shape_cast %30 : vector<1x8x1xf32> to vector<8x1xf32>
    %32 = vector.shape_cast %29 : vector<8x1xf32> to vector<1x8x1xf32>
    tpu.vector_store %arg3[%c0_19, %c0_20, %c0_21], %32 {strides = array<i32>} : memref<1x8x1xf32, #tpu.memory_space<vmem>>, vector<1x8x1xf32>,
    %c0_22 = arith.constant 0 : index
    %c0_23 = arith.constant 0 : index
    %33 = vector.load %arg6[%c0_22, %c0_23] : memref<8x1xf32, #tpu.memory_space<vmem>>, vector<8x1xf32>
    %c0_24 = arith.constant 0 : index
    %c0_25 = arith.constant 0 : index
    %c0_26 = arith.constant 0 : index
    %34 = vector.load %arg4[%c0_24, %c0_25, %c0_26] : memref<1x8x1xf32, #tpu.memory_space<vmem>>, vector<1x8x1xf32>
    %35 = vector.shape_cast %34 : vector<1x8x1xf32> to vector<8x1xf32>
    %36 = vector.shape_cast %33 : vector<8x1xf32> to vector<1x8x1xf32>
    tpu.vector_store %arg4[%c0_24, %c0_25, %c0_26], %36 {strides = array<i32>} : memref<1x8x1xf32, #tpu.memory_space<vmem>>, vector<1x8x1xf32>,
    return
  }
  func.func @transform_0(%arg0: i32) -> (i32, i32) {
    %c0_i32 = arith.constant 0 : i32
    %c0_i32_0 = arith.constant 0 : i32
    %c0_i32_1 = arith.constant 0 : i32
    return %c0_i32, %c0_i32_0 : i32, i32
  }
  func.func @transform_1(%arg0: i32) -> (i32, i32) {
    %c0_i32 = arith.constant 0 : i32
    %c0_i32_0 = arith.constant 0 : i32
    return %arg0, %c0_i32 : i32, i32
  }
  func.func @transform_2(%arg0: i32) -> (i32, i32, i32) {
    %c0_i32 = arith.constant 0 : i32
    %c0_i32_0 = arith.constant 0 : i32
    %c0_i32_1 = arith.constant 0 : i32
    return %arg0, %c0_i32, %c0_i32_0 : i32, i32, i32
  }
  func.func @transform_3(%arg0: i32) -> (i32, i32, i32) {
    %c0_i32 = arith.constant 0 : i32
    %c0_i32_0 = arith.constant 0 : i32
    %c0_i32_1 = arith.constant 0 : i32
    return %arg0, %c0_i32, %c0_i32_0 : i32, i32, i32
  }
}

</mosaic_0001>

<bundles_post_ra>
// kernel: tpu_custom_call.1
= control target key start
LH: loop header
LB: loop body
LE: loop exit
PB: predicated region body
PF: predicated region fallthrough
CT: control target
= control target key end

     0   :  { %9 = vsyncpa [#allocation5], 0  ;;  %s231_s0 = inlined_call_operand.hbm [shape: f32[1,255], index: 0, kind: input, shape index: {}]   ;;  %s232_s1 = inlined_call_operand.hbm [shape: f32[8,256], index: 1, kind: input, shape index: {}]   ;;  %s233_s2 = inlined_call_operand.vmem [shape: f32[1,8,1], index: 2, kind: output, shape index: {0}]   ;;  %s234_s3 = inlined_call_operand.vmem [shape: f32[1,8,1], index: 3, kind: output, shape index: {1}]  }
   0x1   :  { %10 = vsyncpa [#allocation7], 0  ;;  %s166_s12 = smov [#allocation4]   ;;  %s167_s14 = smov [#allocation6]  }
   0x2   :  { %s17_s13 = sshll.u32 %s166_s12, 4  ;;  %s27_s15 = sshll.u32 %s167_s14, 4  ;;  %s18_s13 = int_to_ptr.vmem [resolvable:$true] %s17_s13  ;;  %s28_s15 = int_to_ptr.vmem [resolvable:$true] %s27_s15 }
   0x3   :  { %s118_s18 = scalar_lea.hbm %s231_s0, 32 }
   0x4   :  { %p119_p0 = scmp.ne.s32.totalorder %s231_s0, %s118_s18  ;;  %p122_p1 = scmp.lt.u32.totalorder %s118_s18, %s231_s0 }
   0x6   :  { %p124_p2 = pnand %p122_p1, %p119_p0 }
   0x8   :  { %127 = shalt.err (!%p124_p2)
}
   0x9   :  { %s128_s23 = scalar_lea.vmem %s18_s13, 32  ;;  %p133_p4 = scmp.lt.s32.totalorder %s18_s13, %s18_s13 }
   0xa   :  { %p129_p3 = scmp.ne.s32.totalorder %s18_s13, %s128_s23  ;;  %p134_p5 = scmp.lt.s32.totalorder %s128_s23, %s128_s23 }
   0xc   :  { %p135_p6 = por %p134_p5, %p133_p4 }
   0xe   :  { %p136_p7 = pnand %p135_p6, %p129_p3 }
  0x10   :  { %139 = shalt.err (!%p136_p7)
}
  0x11   :  { %20 = dma.hbm_to_vmem [thread:$0]  %s231_s0, 32, %s18_s13, [#allocation5]  }
  0x12   :  { %s140_s28 = scalar_lea.hbm %s232_s1, 256 }
  0x13   :  { %p141_p8 = scmp.ne.s32.totalorder %s232_s1, %s140_s28  ;;  %p144_p9 = scmp.lt.u32.totalorder %s140_s28, %s232_s1 }
  0x15   :  { %p146_p10 = pnand %p144_p9, %p141_p8 }
  0x17   :  { %149 = shalt.err (!%p146_p10)
}
  0x18   :  { %s150_s6 = scalar_lea.vmem %s28_s15, 256  ;;  %p155_p12 = scmp.lt.s32.totalorder %s28_s15, %s28_s15 }
  0x19   :  { %p151_p11 = scmp.ne.s32.totalorder %s28_s15, %s150_s6  ;;  %p156_p13 = scmp.lt.s32.totalorder %s150_s6, %s150_s6 }
  0x1b   :  { %p157_p0 = por %p156_p13, %p155_p12 }
  0x1d   :  { %p158_p1 = pnand %p157_p0, %p151_p11 }
  0x1f   :  { %161 = shalt.err (!%p158_p1)
}
  0x20   :  { %30 = dma.hbm_to_vmem [thread:$0]  %s232_s1, 256, %s28_s15, [#allocation7]  }
  0x21   :  { %162 = dma.done.wait [#allocation5], 32  }
  0x22   :  { %163 = vsyncadd [#allocation5], 4294967264 }
  0x23   :  { %164 = dma.done.wait [#allocation7], 256  }
  0x24   :  { %165 = vsyncadd [#allocation7], 4294967040  ;;  %v44_v0 = vld [vmem:[#allocation6] sm:$0xff]  ;;  %s168_s8 = smov 112   ;;  %s169_s9 = smov 127   ;;  %vm38_vm0 = vcmask 7168   ;;  %v73_v3 = vlaneseq }
  0x25   :  { %48 = vrot.lane.b32.xlu1 %v44_v0, %s168_s8  ;;  %60 = vrot.lane.b32.xlu0 %v44_v0, %s169_s9  ;;  %v45_v1 = vld [vmem:[#allocation6 + $0x8] sm:$0xff]  ;;  %v170_v2 = vmov 0.0   ;;  %v37_v8 = vld [vmem:[#allocation4] sm:$0x3]  ;;  %vm52_vm1 = vcmask 916480   ;;  %vm64_vm2 = vcmask 1039360  }
  0x26   :  { %39 = vst.msk [vmem:[#allocation2] sm:$0xff] %vm38_vm0, %v170_v2  ;;  %40 = vst.msk [vmem:[#allocation3] sm:$0xff] %vm38_vm0, %v170_v2  ;;  %v74_v4 = vshrl.u32 %v73_v3, 7 }
  0x28   :  { %v79_v7 = vsub.s32 1, %v74_v4  ;;  %v75_v9 = vsub.s32 0, %v74_v4 }
  0x29   :  { %50 = vrot.lane.b32.xlu1 %v45_v1, %s168_s8  ;;  %62 = vrot.lane.b32.xlu0 %v45_v1, %s169_s9 }
  0x2a   :  { %v80_v12 = vrot.slane %v37_v8, %v79_v7  ;;  %v76_v19 = vrot.slane %v37_v8, %v75_v9 }
  0x2d   :  { %v85_v30 = vld [vmem:[#allocation2] sm:$0xff]  ;;  %v92_v32 = vld [vmem:[#allocation3] sm:$0xff] }
  0x97   :  { %v49_v5 = vpop.permute.xlu1 %48  ;;  %v61_v6 = vpop.permute.xlu0 %60 }
  0x9b   :  { %v51_v10 = vpop.permute.xlu1 %50  ;;  %v63_v11 = vpop.permute.xlu0 %62 }
  0x9c   :  { %v53_v13 = vsel %vm52_vm1, %v49_v5, %v51_v10  ;;  %v57_v14 = vsub.f32 %v45_v1, %v51_v10  ;;  %v65_v15 = vsel %vm64_vm2, %v61_v6, %v63_v11  ;;  %v69_v16 = vsub.f32 %v45_v1, %v63_v11 }
  0x9d   :  { %v56_v17 = vsub.f32 %v44_v0, %v53_v13  ;;  %v68_v18 = vsub.f32 %v44_v0, %v65_v15 }
  0x9e   :  { %v59_v20 = vand.u32 2147483647, %v57_v14  ;;  %v71_v21 = vand.u32 2147483647, %v69_v16 }
  0x9f   :  { %v58_v22 = vand.u32 2147483647, %v56_v17  ;;  %v70_v23 = vand.u32 2147483647, %v68_v18 }
  0xa0   :  { %v84_v24 = vmul.f32 %v80_v12, %v71_v21  ;;  %v86_v25 = vsel %vm52_vm1, %v59_v20, 0.0 }
  0xa1   :  { %v87_v26 = vadd.f32 %v86_v25, %v58_v22  ;;  %v83_v27 = vmul.f32 %v76_v19, %v70_v23 }
  0xa2   :  { %v93_v28 = vsel %vm64_vm2, %v84_v24, 0.0 }
  0xa3   :  { %88 = vadd.xlane.f32.xlu0 %v87_v26  ;;  %v94_v29 = vadd.f32 %v93_v28, %v83_v27 }
  0xa5   :  { %95 = vadd.xlane.f32.xlu1 %v94_v29 }
 0x130   :  { %v89_v31 = vpop.xlane.xlu0 %88 }
 0x131   :  { %v90_v33 = vadd.f32 %v89_v31, %v85_v30 }
 0x132   :  { %v96_v34 = vpop.xlane.xlu1 %95 }
 0x133   :  { %91 = vst.msk [vmem:[#allocation2] sm:$0xff] %vm38_vm0, %v90_v33  ;;  %v97_v35 = vadd.f32 %v96_v34, %v92_v32 }
 0x135   :  { %98 = vst.msk [vmem:[#allocation3] sm:$0xff] %vm38_vm0, %v97_v35 }
 0x13a   :  { %v99_v36 = vld [vmem:[#allocation2] sm:$0xff] }
 0x13b   :  { %100 = vst.msk [vmem:[%s233_s2] sm:$0xff] %vm38_vm0, %v99_v36 }
 0x13c   :  { %v101_v37 = vld [vmem:[#allocation3] sm:$0xff] }
 0x13d   :  { %102 = vst.msk [vmem:[%s234_s3] sm:$0xff] %vm38_vm0, %v101_v37 }
 0x13e   :  { %111 = vsyncpa [#allocation5], 1 }
 0x13f   :  { %112 = vsyncpa [#allocation7], 1 }

</bundles_post_ra>
